<compile_context>
chip_gen: v5e
topology: v5e:2x2
jax: 0.10.0
libtpu: 0.0.40
codegen_flags: <defaults>
</compile_context>

<pallas_src>
import functools

import jax
import jax.numpy as jnp
from jax import lax
from jax.experimental import pallas as pl
from jax.experimental.pallas import tpu as pltpu


# ---------------------------------------------------------------------------
# Kernel 1: per-batch-element fused  embedding -> 3x(conv5 + BN(eval) + ReLU
# + residual).  Channels on lanes, time on sublanes; the conv is K shifted
# [T, D] @ [D, D] MXU matmuls against a zero-padded VMEM time buffer.
# ---------------------------------------------------------------------------
def _embed_conv_kernel(ids_ref, emb_ref, w_ref, scale_ref, shift_ref,
                       o_ref, buf_ref, *, n_layers, ksize):
    t_len, dim = o_ref.shape[1], o_ref.shape[2]
    vocab = emb_ref.shape[0]
    pad = (ksize - 1) // 2

    # Embedding lookup (padding_idx=0 row of the table is zero).
    ids = ids_ref[0]                                            # [T, 1] int32
    iota = lax.broadcasted_iota(jnp.int32, (t_len, vocab), 1)
    onehot = (iota == ids).astype(jnp.float32)                  # [T, V]
    x0 = jnp.dot(onehot, emb_ref[...].astype(jnp.float32),
                 preferred_element_type=jnp.float32)            # [T, D]

    buf_ref[...] = jnp.zeros_like(buf_ref)                      # zero the pad rows
    buf_ref[pad:pad + t_len, :] = x0

    for layer in range(n_layers):
        acc = jnp.zeros((t_len, dim), jnp.float32)
        for k in range(ksize):                                  # K shifted matmuls
            acc = acc + jnp.dot(buf_ref[k:k + t_len, :], w_ref[layer, k],
                                preferred_element_type=jnp.float32)
        y = jnp.maximum(acc * scale_ref[layer] + shift_ref[layer], 0.0)
        # TODO(synk): training-mode dropout(0.5) on `y` needs pltpu.prng_seed /
        # prng_random_bits with a program_id-mixed seed (eval mode = identity).
        buf_ref[pad:pad + t_len, :] = y + buf_ref[pad:pad + t_len, :]   # residual

    o_ref[0] = buf_ref[pad:pad + t_len, :].astype(o_ref.dtype)


def embed_conv(ids, emb, w, scale, shift, *, ksize):
    b, t_len = ids.shape
    vocab, dim = emb.shape
    n_layers = w.shape[0]
    pad = (ksize - 1) // 2
    ids3 = ids.astype(jnp.int32).reshape(b, t_len, 1)
    kernel = functools.partial(_embed_conv_kernel, n_layers=n_layers, ksize=ksize)
    return pl.pallas_call(
        kernel,
        out_shape=jax.ShapeDtypeStruct((b, t_len, dim), emb.dtype),
        grid=(b,),
        in_specs=[
            pl.BlockSpec((1, t_len, 1), lambda i: (i, 0, 0)),               # ids (tiled)
            pl.BlockSpec((vocab, dim), lambda i: (0, 0)),                   # table (resident)
            pl.BlockSpec((n_layers, ksize, dim, dim), lambda i: (0, 0, 0, 0)),
            pl.BlockSpec((n_layers, 1, dim), lambda i: (0, 0, 0)),          # BN scale
            pl.BlockSpec((n_layers, 1, dim), lambda i: (0, 0, 0)),          # BN shift
        ],
        out_specs=pl.BlockSpec((1, t_len, dim), lambda i: (i, 0, 0)),
        scratch_shapes=[pltpu.VMEM((t_len + 2 * pad, dim), jnp.float32)],
        compiler_params=pltpu.CompilerParams(
            dimension_semantics=("parallel",)),
    )(ids3, emb, w, scale, shift)


# ---------------------------------------------------------------------------
# Kernel 2: bidirectional LSTM over time-major [T, B, D] with per-sequence
# length masking (emulates pack_padded_sequence): padded steps emit zeros and
# the reverse direction starts its recurrence at t = len-1 with zero state.
# ---------------------------------------------------------------------------
def _bilstm_kernel(x_ref, len_ref, win_ref, bin_ref, whf_ref, whb_ref,
                   of_ref, ob_ref, gxf_ref, gxb_ref, *, hidden):
    t_len, b = x_ref.shape[0], x_ref.shape[1]
    h = hidden
    lens = len_ref[...]                                         # [B, 1] int32
    zeros = jnp.zeros((b, h), jnp.float32)

    w_in, b_in = win_ref[...], bin_ref[...]                     # [D, 8H], [1, 8H]
    w_hf, w_hb = whf_ref[...], whb_ref[...]                     # [H, 4H] each

    # Pass 1: time-parallel input projection for BOTH directions with a single
    # full-lane-width [B, D] @ [D, 8H] matmul per step.  No cross-step data
    # dependency -> MXU pipeline stays fed; results live in VMEM scratch so the
    # recurrence below only does the small hidden-state matmul.
    def proj_step(t, carry):
        g = jnp.dot(x_ref[t].astype(jnp.float32), w_in,
                    preferred_element_type=jnp.float32) + b_in  # [B, 8H]
        gxf_ref[t] = g[:, :4 * h]
        gxb_ref[t] = g[:, 4 * h:]
        return carry

    lax.fori_loop(0, t_len, proj_step, 0)

    def cell(gates_x, h_prev, c_prev, w_hh):
        gates = gates_x + jnp.dot(h_prev, w_hh, preferred_element_type=jnp.float32)
        i_g = 1.0 / (1.0 + jnp.exp(-gates[:, 0:h]))
        f_g = 1.0 / (1.0 + jnp.exp(-gates[:, h:2 * h]))
        g_g = jnp.tanh(gates[:, 2 * h:3 * h])
        o_g = 1.0 / (1.0 + jnp.exp(-gates[:, 3 * h:4 * h]))
        c_new = f_g * c_prev + i_g * g_g
        h_new = o_g * jnp.tanh(c_new)
        return h_new, c_new

    def fwd_step(t, carry):
        h_prev, c_prev = carry
        h_new, c_new = cell(gxf_ref[t], h_prev, c_prev, w_hf)
        valid = t < lens                                        # [B, 1] bool
        of_ref[t] = jnp.where(valid, h_new, 0.0).astype(of_ref.dtype)
        return (jnp.where(valid, h_new, h_prev), jnp.where(valid, c_new, c_prev))

    lax.fori_loop(0, t_len, fwd_step, (zeros, zeros))

    def bwd_step(i, carry):
        h_prev, c_prev = carry
        t = t_len - 1 - i
        h_new, c_new = cell(gxb_ref[t], h_prev, c_prev, w_hb)
        valid = t < lens                                        # state stays 0 until t = len-1
        ob_ref[t] = jnp.where(valid, h_new, 0.0).astype(ob_ref.dtype)
        return (jnp.where(valid, h_new, h_prev), jnp.where(valid, c_new, c_prev))

    lax.fori_loop(0, t_len, bwd_step, (zeros, zeros))


def bilstm(x_tm, lengths, w_in, b_in, w_hf, w_hb, *, hidden):
    t_len, b, dim = x_tm.shape
    tile_b = 8 if b % 8 == 0 else b                             # batch tiling for large B
    kernel = functools.partial(_bilstm_kernel, hidden=hidden)
    out_f, out_b = pl.pallas_call(
        kernel,
        out_shape=(jax.ShapeDtypeStruct((t_len, b, hidden), x_tm.dtype),
                   jax.ShapeDtypeStruct((t_len, b, hidden), x_tm.dtype)),
        grid=(b // tile_b,),
        in_specs=[
            pl.BlockSpec((t_len, tile_b, dim), lambda i: (0, i, 0)),    # x (batch-tiled)
            pl.BlockSpec((tile_b, 1), lambda i: (i, 0)),                # lengths
            pl.BlockSpec(w_in.shape, lambda i: (0, 0)),                 # resident weights
            pl.BlockSpec(b_in.shape, lambda i: (0, 0)),
            pl.BlockSpec(w_hf.shape, lambda i: (0, 0)),
            pl.BlockSpec(w_hb.shape, lambda i: (0, 0)),
        ],
        out_specs=(pl.BlockSpec((t_len, tile_b, hidden), lambda i: (0, i, 0)),
                   pl.BlockSpec((t_len, tile_b, hidden), lambda i: (0, i, 0))),
        scratch_shapes=[pltpu.VMEM((t_len, tile_b, 4 * hidden), jnp.float32),
                        pltpu.VMEM((t_len, tile_b, 4 * hidden), jnp.float32)],
        compiler_params=pltpu.CompilerParams(
            dimension_semantics=("parallel",)),
    )(x_tm, lengths.reshape(b, 1).astype(jnp.int32), w_in, b_in, w_hf, w_hb)
    return out_f, out_b


# ---------------------------------------------------------------------------
# Parameter preparation (done once, outside the per-call path) + forward.
# ---------------------------------------------------------------------------
def prepare_params(raw, *, eps=1e-5):
    """PyTorch-layout params -> kernel-ready layouts.
    Conv weights [out,in,K] -> [L,K,in,out]; conv bias + BatchNorm(eval) running
    stats folded into per-channel scale/shift; LSTM input weights of both
    directions concatenated into one [D, 8H] matrix, biases summed."""
    convs = raw["convs"]
    dim = convs[0]["w"].shape[0]
    conv_w = jnp.stack([jnp.transpose(c["w"], (2, 1, 0)) for c in convs])
    scales, shifts = [], []
    for c in convs:
        s = c["gamma"] / jnp.sqrt(c["var"] + eps)
        scales.append(s)
        shifts.append(c["beta"] + (c["b"] - c["mean"]) * s)
    lstm = raw["lstm"]
    hidden = lstm["w_hh_f"].shape[1]
    w_in = jnp.concatenate([lstm["w_ih_f"].T, lstm["w_ih_b"].T], axis=1)     # [D, 8H]
    b_in = jnp.concatenate([lstm["b_ih_f"] + lstm["b_hh_f"],
                            lstm["b_ih_b"] + lstm["b_hh_b"]]).reshape(1, 8 * hidden)
    return dict(
        embedding=raw["embedding"],
        conv_w=conv_w,
        conv_scale=jnp.stack(scales).reshape(len(convs), 1, dim),
        conv_shift=jnp.stack(shifts).reshape(len(convs), 1, dim),
        w_in=w_in, b_in=b_in,
        w_hf=lstm["w_hh_f"].T, w_hb=lstm["w_hh_b"].T,
    )


def rnn_encoder_forward(ids, params, *, kernel_size=5):
    """ids: [B, T] int tokens (0 = padding).  Returns [B, T, D] (padded steps are 0)."""
    b, t_len = ids.shape
    emb = params["embedding"]
    dim = emb.shape[1]
    hidden = dim // 2

    # (x > 0).sum(-1) — kept on device (no .cpu().numpy() equivalent needed).
    lengths = jnp.sum((ids > 0).astype(jnp.int32), axis=-1)

    x = embed_conv(ids, emb, params["conv_w"], params["conv_scale"],
                   params["conv_shift"], ksize=kernel_size)
    x_tm = jnp.transpose(x, (1, 0, 2))                          # time-major [T, B, D]
    out_f, out_b = bilstm(x_tm, lengths, params["w_in"], params["b_in"],
                          params["w_hf"], params["w_hb"], hidden=hidden)
    # TODO(synk): pad_packed_sequence trims to max(lengths); we keep full T with zeros.
    return jnp.concatenate([jnp.transpose(out_f, (1, 0, 2)),
                            jnp.transpose(out_b, (1, 0, 2))], axis=-1)


# ---------------------------------------------------------------------------
# Pure-JAX reference (eval mode), used only for verification.
# ---------------------------------------------------------------------------
def rnn_encoder_reference(ids, raw, *, kernel_size=5, eps=1e-5):
    emb = raw["embedding"]
    b, t_len = ids.shape
    dim = emb.shape[1]
    hidden = dim // 2
    lengths = jnp.sum((ids > 0).astype(jnp.int32), axis=-1)

    x = emb[ids]                                                # [B, T, D]
    h = jnp.transpose(x, (0, 2, 1))                             # [B, D, T]
    for c in raw["convs"]:
        y = lax.conv_general_dilated(h, c["w"], window_strides=(1,), padding="SAME",
                                     dimension_numbers=("NCH", "OIH", "NCH"))
        y = y + c["b"][None, :, None]
        y = ((y - c["mean"][None, :, None])
             * (c["gamma"][None, :, None] / jnp.sqrt(c["var"][None, :, None] + eps))
             + c["beta"][None, :, None])
        h = jnp.maximum(y, 0.0) + h
    x = jnp.transpose(h, (0, 2, 1))                             # [B, T, D]

    def run_dir(w_ih, w_hh, b_ih, b_hh, reverse):
        hh = jnp.zeros((b, hidden), jnp.float32)
        cc = jnp.zeros((b, hidden), jnp.float32)
        out = jnp.zeros((b, t_len, hidden), jnp.float32)
        steps = range(t_len - 1, -1, -1) if reverse else range(t_len)
        for t in steps:
            gates = x[:, t, :] @ w_ih.T + hh @ w_hh.T + b_ih + b_hh
            i_g = 1.0 / (1.0 + jnp.exp(-gates[:, 0:hidden]))
            f_g = 1.0 / (1.0 + jnp.exp(-gates[:, hidden:2 * hidden]))
            g_g = jnp.tanh(gates[:, 2 * hidden:3 * hidden])
            o_g = 1.0 / (1.0 + jnp.exp(-gates[:, 3 * hidden:4 * hidden]))
            c_new = f_g * cc + i_g * g_g
            h_new = o_g * jnp.tanh(c_new)
            valid = (t < lengths)[:, None]
            out = out.at[:, t, :].set(jnp.where(valid, h_new, 0.0))
            hh = jnp.where(valid, h_new, hh)
            cc = jnp.where(valid, c_new, cc)
        return out

    lp = raw["lstm"]
    out_f = run_dir(lp["w_ih_f"], lp["w_hh_f"], lp["b_ih_f"], lp["b_hh_f"], False)
    out_b = run_dir(lp["w_ih_b"], lp["w_hh_b"], lp["b_ih_b"], lp["b_hh_b"], True)
    return jnp.concatenate([out_f, out_b], axis=-1)


if __name__ == "__main__":
    key = jax.random.PRNGKey(0)
    num_chars, embedding_dim = 40, 32
    n_convolutions, kernel_size = 3, 5
    batch, seq = 2, 8
    hidden = embedding_dim // 2

    keys = jax.random.split(key, 16)
    ids = jax.random.randint(keys[0], (batch, seq), 1, num_chars, dtype=jnp.int32)
    ids = ids.at[1, 5:].set(0)                     # second sequence has length 5

    emb = 0.1 * jax.random.normal(keys[1], (num_chars, embedding_dim), jnp.float32)
    emb = emb.at[0].set(0.0)                       # padding_idx = 0

    convs = []
    for l in range(n_convolutions):
        kk = jax.random.split(keys[2 + l], 6)
        convs.append(dict(
            w=0.05 * jax.random.normal(kk[0], (embedding_dim, embedding_dim, kernel_size), jnp.float32),
            b=0.05 * jax.random.normal(kk[1], (embedding_dim,), jnp.float32),
            gamma=1.0 + 0.1 * jax.random.normal(kk[2], (embedding_dim,), jnp.float32),
            beta=0.1 * jax.random.normal(kk[3], (embedding_dim,), jnp.float32),
            mean=0.1 * jax.random.normal(kk[4], (embedding_dim,), jnp.float32),
            var=jax.random.uniform(kk[5], (embedding_dim,), jnp.float32, 0.5, 1.5),
        ))

    kl = jax.random.split(keys[10], 8)
    lstm = dict(
        w_ih_f=0.1 * jax.random.normal(kl[0], (4 * hidden, embedding_dim), jnp.float32),
        w_hh_f=0.1 * jax.random.normal(kl[1], (4 * hidden, hidden), jnp.float32),
        b_ih_f=0.1 * jax.random.normal(kl[2], (4 * hidden,), jnp.float32),
        b_hh_f=0.1 * jax.random.normal(kl[3], (4 * hidden,), jnp.float32),
        w_ih_b=0.1 * jax.random.normal(kl[4], (4 * hidden, embedding_dim), jnp.float32),
        w_hh_b=0.1 * jax.random.normal(kl[5], (4 * hidden, hidden), jnp.float32),
        b_ih_b=0.1 * jax.random.normal(kl[6], (4 * hidden,), jnp.float32),
        b_hh_b=0.1 * jax.random.normal(kl[7], (4 * hidden,), jnp.float32),
    )

    raw = dict(embedding=emb, convs=convs, lstm=lstm)
    params = prepare_params(raw)

    out = rnn_encoder_forward(ids, params, kernel_size=kernel_size)
    jax.block_until_ready(out)
    assert out.shape == (batch, seq, embedding_dim), out.shape

    ref = rnn_encoder_reference(ids, raw, kernel_size=kernel_size)
    max_err = float(jnp.max(jnp.abs(out - ref)))
    assert jnp.allclose(out, ref, atol=2e-3, rtol=2e-3), f"mismatch, max_err={max_err}"

    # pack_padded_sequence semantics: padded timesteps of the short sequence are 0.
    assert bool(jnp.all(out[1, 5:, :] == 0.0))

    print("KERNEL_OK")
</pallas_src>

<mosaic_0001>
module attributes {stable_mosaic.version = 11 : i64} {
  func.func @_embed_conv_kernel(%arg0: i32, %arg1: memref<1x8x1xi32, #tpu.memory_space<vmem>>, %arg2: memref<40x32xf32, #tpu.memory_space<vmem>>, %arg3: memref<3x5x32x32xf32, #tpu.memory_space<vmem>>, %arg4: memref<3x1x32xf32, #tpu.memory_space<vmem>>, %arg5: memref<3x1x32xf32, #tpu.memory_space<vmem>>, %arg6: memref<1x8x32xf32, #tpu.memory_space<vmem>>, %arg7: memref<12x32xf32, #tpu.memory_space<vmem>>) attributes {dimension_semantics = [#tpu.dimension_semantics<parallel>], iteration_bounds = array<i64: 2>, scalar_prefetch = 0 : i64, scratch_operands = 1 : i64, tpu.core_type = #tpu.core_type<tc>, window_params = [{transform_indices = @transform_0, window_bounds = array<i64: 1, 8, 1>}, {pipeline_mode = #tpu.pipeline_mode<synchronous>, transform_indices = @transform_1, window_bounds = array<i64: 40, 32>}, {pipeline_mode = #tpu.pipeline_mode<synchronous>, transform_indices = @transform_2, window_bounds = array<i64: 3, 5, 32, 32>}, {pipeline_mode = #tpu.pipeline_mode<synchronous>, transform_indices = @transform_3, window_bounds = array<i64: 3, 1, 32>}, {pipeline_mode = #tpu.pipeline_mode<synchronous>, transform_indices = @transform_4, window_bounds = array<i64: 3, 1, 32>}, {transform_indices = @transform_5, window_bounds = array<i64: 1, 8, 32>}]} {
    %c0 = arith.constant 0 : index
    %c0_0 = arith.constant 0 : index
    %c0_1 = arith.constant 0 : index
    %0 = vector.load %arg1[%c0, %c0_0, %c0_1] : memref<1x8x1xi32, #tpu.memory_space<vmem>>, vector<1x8x1xi32>
    %1 = vector.shape_cast %0 : vector<1x8x1xi32> to vector<8x1xi32>
    %2 = tpu.iota {dimensions = array<i32: 1>} : vector<8x40xi32>
    %3 = vector.broadcast %1 : vector<8x1xi32> to vector<8x40xi32>
    %4 = arith.cmpi eq, %2, %3 : vector<8x40xi32>
    %5 = arith.extui %4 : vector<8x40xi1> to vector<8x40xi32>
    %6 = arith.sitofp %5 : vector<8x40xi32> to vector<8x40xf32>
    %c0_2 = arith.constant 0 : index
    %c0_3 = arith.constant 0 : index
    %7 = vector.load %arg2[%c0_2, %c0_3] : memref<40x32xf32, #tpu.memory_space<vmem>>, vector<40x32xf32>
    %cst = arith.constant dense<0.000000e+00> : vector<8x32xf32>
    %8 = tpu.matmul %6, %7, %cst {dimension_numbers = #tpu.dot_dimension_numbers<[1], [0], [0], [1], [0, 0, 1, 1], [], []>} : vector<8x40xf32>, vector<40x32xf32>, vector<8x32xf32> -> vector<8x32xf32>
    %cst_4 = arith.constant 0.000000e+00 : f32
    %9 = vector.broadcast %cst_4 : f32 to vector<12x32xf32>
    %c0_5 = arith.constant 0 : index
    %c0_6 = arith.constant 0 : index
    %10 = vector.load %arg7[%c0_5, %c0_6] : memref<12x32xf32, #tpu.memory_space<vmem>>, vector<12x32xf32>
    tpu.vector_store %arg7[%c0_5, %c0_6], %9 {strides = array<i32>} : memref<12x32xf32, #tpu.memory_space<vmem>>, vector<12x32xf32>,
    %c2 = arith.constant 2 : index
    %c0_7 = arith.constant 0 : index
    %11 = vector.load %arg7[%c2, %c0_7] : memref<12x32xf32, #tpu.memory_space<vmem>>, vector<8x32xf32>
    tpu.vector_store %arg7[%c2, %c0_7], %8 {strides = array<i32>} : memref<12x32xf32, #tpu.memory_space<vmem>>, vector<8x32xf32>,
    %cst_8 = arith.constant 0.000000e+00 : f32
    %12 = vector.broadcast %cst_8 : f32 to vector<8x32xf32>
    %c0_9 = arith.constant 0 : index
    %c0_10 = arith.constant 0 : index
    %13 = vector.load %arg7[%c0_9, %c0_10] : memref<12x32xf32, #tpu.memory_space<vmem>>, vector<8x32xf32>
    %c0_11 = arith.constant 0 : index
    %c0_12 = arith.constant 0 : index
    %c0_13 = arith.constant 0 : index
    %c0_14 = arith.constant 0 : index
    %14 = vector.load %arg3[%c0_11, %c0_12, %c0_13, %c0_14] : memref<3x5x32x32xf32, #tpu.memory_space<vmem>>, vector<1x1x32x32xf32>
    %15 = vector.shape_cast %14 : vector<1x1x32x32xf32> to vector<32x32xf32>
    %cst_15 = arith.constant dense<0.000000e+00> : vector<8x32xf32>
    %16 = tpu.matmul %13, %15, %cst_15 {dimension_numbers = #tpu.dot_dimension_numbers<[1], [0], [0], [1], [0, 0, 1, 1], [], []>} : vector<8x32xf32>, vector<32x32xf32>, vector<8x32xf32> -> vector<8x32xf32>
    %17 = arith.addf %12, %16 : vector<8x32xf32>
    %c1 = arith.constant 1 : index
    %c0_16 = arith.constant 0 : index
    %18 = vector.load %arg7[%c1, %c0_16] : memref<12x32xf32, #tpu.memory_space<vmem>>, vector<8x32xf32>
    %c0_17 = arith.constant 0 : index
    %c1_18 = arith.constant 1 : index
    %c0_19 = arith.constant 0 : index
    %c0_20 = arith.constant 0 : index
    %19 = vector.load %arg3[%c0_17, %c1_18, %c0_19, %c0_20] : memref<3x5x32x32xf32, #tpu.memory_space<vmem>>, vector<1x1x32x32xf32>
    %20 = vector.shape_cast %19 : vector<1x1x32x32xf32> to vector<32x32xf32>
    %cst_21 = arith.constant dense<0.000000e+00> : vector<8x32xf32>
    %21 = tpu.matmul %18, %20, %cst_21 {dimension_numbers = #tpu.dot_dimension_numbers<[1], [0], [0], [1], [0, 0, 1, 1], [], []>} : vector<8x32xf32>, vector<32x32xf32>, vector<8x32xf32> -> vector<8x32xf32>
    %22 = arith.addf %17, %21 : vector<8x32xf32>
    %c2_22 = arith.constant 2 : index
    %c0_23 = arith.constant 0 : index
    %23 = vector.load %arg7[%c2_22, %c0_23] : memref<12x32xf32, #tpu.memory_space<vmem>>, vector<8x32xf32>
    %c0_24 = arith.constant 0 : index
    %c2_25 = arith.constant 2 : index
    %c0_26 = arith.constant 0 : index
    %c0_27 = arith.constant 0 : index
    %24 = vector.load %arg3[%c0_24, %c2_25, %c0_26, %c0_27] : memref<3x5x32x32xf32, #tpu.memory_space<vmem>>, vector<1x1x32x32xf32>
    %25 = vector.shape_cast %24 : vector<1x1x32x32xf32> to vector<32x32xf32>
    %cst_28 = arith.constant dense<0.000000e+00> : vector<8x32xf32>
    %26 = tpu.matmul %23, %25, %cst_28 {dimension_numbers = #tpu.dot_dimension_numbers<[1], [0], [0], [1], [0, 0, 1, 1], [], []>} : vector<8x32xf32>, vector<32x32xf32>, vector<8x32xf32> -> vector<8x32xf32>
    %27 = arith.addf %22, %26 : vector<8x32xf32>
    %c3 = arith.constant 3 : index
    %c0_29 = arith.constant 0 : index
    %28 = vector.load %arg7[%c3, %c0_29] : memref<12x32xf32, #tpu.memory_space<vmem>>, vector<8x32xf32>
    %c0_30 = arith.constant 0 : index
    %c3_31 = arith.constant 3 : index
    %c0_32 = arith.constant 0 : index
    %c0_33 = arith.constant 0 : index
    %29 = vector.load %arg3[%c0_30, %c3_31, %c0_32, %c0_33] : memref<3x5x32x32xf32, #tpu.memory_space<vmem>>, vector<1x1x32x32xf32>
    %30 = vector.shape_cast %29 : vector<1x1x32x32xf32> to vector<32x32xf32>
    %cst_34 = arith.constant dense<0.000000e+00> : vector<8x32xf32>
    %31 = tpu.matmul %28, %30, %cst_34 {dimension_numbers = #tpu.dot_dimension_numbers<[1], [0], [0], [1], [0, 0, 1, 1], [], []>} : vector<8x32xf32>, vector<32x32xf32>, vector<8x32xf32> -> vector<8x32xf32>
    %32 = arith.addf %27, %31 : vector<8x32xf32>
    %c4 = arith.constant 4 : index
    %c0_35 = arith.constant 0 : index
    %33 = vector.load %arg7[%c4, %c0_35] : memref<12x32xf32, #tpu.memory_space<vmem>>, vector<8x32xf32>
    %c0_36 = arith.constant 0 : index
    %c4_37 = arith.constant 4 : index
    %c0_38 = arith.constant 0 : index
    %c0_39 = arith.constant 0 : index
    %34 = vector.load %arg3[%c0_36, %c4_37, %c0_38, %c0_39] : memref<3x5x32x32xf32, #tpu.memory_space<vmem>>, vector<1x1x32x32xf32>
    %35 = vector.shape_cast %34 : vector<1x1x32x32xf32> to vector<32x32xf32>
    %cst_40 = arith.constant dense<0.000000e+00> : vector<8x32xf32>
    %36 = tpu.matmul %33, %35, %cst_40 {dimension_numbers = #tpu.dot_dimension_numbers<[1], [0], [0], [1], [0, 0, 1, 1], [], []>} : vector<8x32xf32>, vector<32x32xf32>, vector<8x32xf32> -> vector<8x32xf32>
    %37 = arith.addf %32, %36 : vector<8x32xf32>
    %c0_41 = arith.constant 0 : index
    %c0_42 = arith.constant 0 : index
    %c0_43 = arith.constant 0 : index
    %38 = vector.load %arg4[%c0_41, %c0_42, %c0_43] : memref<3x1x32xf32, #tpu.memory_space<vmem>>, vector<1x1x32xf32>
    %39 = vector.shape_cast %38 : vector<1x1x32xf32> to vector<1x32xf32>
    %40 = vector.broadcast %39 : vector<1x32xf32> to vector<8x32xf32>
    %41 = arith.mulf %37, %40 : vector<8x32xf32>
    %c0_44 = arith.constant 0 : index
    %c0_45 = arith.constant 0 : index
    %c0_46 = arith.constant 0 : index
    %42 = vector.load %arg5[%c0_44, %c0_45, %c0_46] : memref<3x1x32xf32, #tpu.memory_space<vmem>>, vector<1x1x32xf32>
    %43 = vector.shape_cast %42 : vector<1x1x32xf32> to vector<1x32xf32>
    %44 = vector.broadcast %43 : vector<1x32xf32> to vector<8x32xf32>
    %45 = arith.addf %41, %44 : vector<8x32xf32>
    %cst_47 = arith.constant 0.000000e+00 : f32
    %46 = vector.broadcast %cst_47 : f32 to vector<8x32xf32>
    %47 = arith.maximumf %45, %46 : vector<8x32xf32>
    %c2_48 = arith.constant 2 : index
    %c0_49 = arith.constant 0 : index
    %48 = vector.load %arg7[%c2_48, %c0_49] : memref<12x32xf32, #tpu.memory_space<vmem>>, vector<8x32xf32>
    %49 = arith.addf %47, %48 : vector<8x32xf32>
    %c2_50 = arith.constant 2 : index
    %c0_51 = arith.constant 0 : index
    %50 = vector.load %arg7[%c2_50, %c0_51] : memref<12x32xf32, #tpu.memory_space<vmem>>, vector<8x32xf32>
    tpu.vector_store %arg7[%c2_50, %c0_51], %49 {strides = array<i32>} : memref<12x32xf32, #tpu.memory_space<vmem>>, vector<8x32xf32>,
    %cst_52 = arith.constant 0.000000e+00 : f32
    %51 = vector.broadcast %cst_52 : f32 to vector<8x32xf32>
    %c0_53 = arith.constant 0 : index
    %c0_54 = arith.constant 0 : index
    %52 = vector.load %arg7[%c0_53, %c0_54] : memref<12x32xf32, #tpu.memory_space<vmem>>, vector<8x32xf32>
    %c1_55 = arith.constant 1 : index
    %c0_56 = arith.constant 0 : index
    %c0_57 = arith.constant 0 : index
    %c0_58 = arith.constant 0 : index
    %53 = vector.load %arg3[%c1_55, %c0_56, %c0_57, %c0_58] : memref<3x5x32x32xf32, #tpu.memory_space<vmem>>, vector<1x1x32x32xf32>
    %54 = vector.shape_cast %53 : vector<1x1x32x32xf32> to vector<32x32xf32>
    %cst_59 = arith.constant dense<0.000000e+00> : vector<8x32xf32>
    %55 = tpu.matmul %52, %54, %cst_59 {dimension_numbers = #tpu.dot_dimension_numbers<[1], [0], [0], [1], [0, 0, 1, 1], [], []>} : vector<8x32xf32>, vector<32x32xf32>, vector<8x32xf32> -> vector<8x32xf32>
    %56 = arith.addf %51, %55 : vector<8x32xf32>
    %c1_60 = arith.constant 1 : index
    %c0_61 = arith.constant 0 : index
    %57 = vector.load %arg7[%c1_60, %c0_61] : memref<12x32xf32, #tpu.memory_space<vmem>>, vector<8x32xf32>
    %c1_62 = arith.constant 1 : index
    %c1_63 = arith.constant 1 : index
    %c0_64 = arith.constant 0 : index
    %c0_65 = arith.constant 0 : index
    %58 = vector.load %arg3[%c1_62, %c1_63, %c0_64, %c0_65] : memref<3x5x32x32xf32, #tpu.memory_space<vmem>>, vector<1x1x32x32xf32>
    %59 = vector.shape_cast %58 : vector<1x1x32x32xf32> to vector<32x32xf32>
    %cst_66 = arith.constant dense<0.000000e+00> : vector<8x32xf32>
    %60 = tpu.matmul %57, %59, %cst_66 {dimension_numbers = #tpu.dot_dimension_numbers<[1], [0], [0], [1], [0, 0, 1, 1], [], []>} : vector<8x32xf32>, vector<32x32xf32>, vector<8x32xf32> -> vector<8x32xf32>
    %61 = arith.addf %56, %60 : vector<8x32xf32>
    %c2_67 = arith.constant 2 : index
    %c0_68 = arith.constant 0 : index
    %62 = vector.load %arg7[%c2_67, %c0_68] : memref<12x32xf32, #tpu.memory_space<vmem>>, vector<8x32xf32>
    %c1_69 = arith.constant 1 : index
    %c2_70 = arith.constant 2 : index
    %c0_71 = arith.constant 0 : index
    %c0_72 = arith.constant 0 : index
    %63 = vector.load %arg3[%c1_69, %c2_70, %c0_71, %c0_72] : memref<3x5x32x32xf32, #tpu.memory_space<vmem>>, vector<1x1x32x32xf32>
    %64 = vector.shape_cast %63 : vector<1x1x32x32xf32> to vector<32x32xf32>
    %cst_73 = arith.constant dense<0.000000e+00> : vector<8x32xf32>
    %65 = tpu.matmul %62, %64, %cst_73 {dimension_numbers = #tpu.dot_dimension_numbers<[1], [0], [0], [1], [0, 0, 1, 1], [], []>} : vector<8x32xf32>, vector<32x32xf32>, vector<8x32xf32> -> vector<8x32xf32>
    %66 = arith.addf %61, %65 : vector<8x32xf32>
    %c3_74 = arith.constant 3 : index
    %c0_75 = arith.constant 0 : index
    %67 = vector.load %arg7[%c3_74, %c0_75] : memref<12x32xf32, #tpu.memory_space<vmem>>, vector<8x32xf32>
    %c1_76 = arith.constant 1 : index
    %c3_77 = arith.constant 3 : index
    %c0_78 = arith.constant 0 : index
    %c0_79 = arith.constant 0 : index
    %68 = vector.load %arg3[%c1_76, %c3_77, %c0_78, %c0_79] : memref<3x5x32x32xf32, #tpu.memory_space<vmem>>, vector<1x1x32x32xf32>
    %69 = vector.shape_cast %68 : vector<1x1x32x32xf32> to vector<32x32xf32>
    %cst_80 = arith.constant dense<0.000000e+00> : vector<8x32xf32>
    %70 = tpu.matmul %67, %69, %cst_80 {dimension_numbers = #tpu.dot_dimension_numbers<[1], [0], [0], [1], [0, 0, 1, 1], [], []>} : vector<8x32xf32>, vector<32x32xf32>, vector<8x32xf32> -> vector<8x32xf32>
    %71 = arith.addf %66, %70 : vector<8x32xf32>
    %c4_81 = arith.constant 4 : index
    %c0_82 = arith.constant 0 : index
    %72 = vector.load %arg7[%c4_81, %c0_82] : memref<12x32xf32, #tpu.memory_space<vmem>>, vector<8x32xf32>
    %c1_83 = arith.constant 1 : index
    %c4_84 = arith.constant 4 : index
    %c0_85 = arith.constant 0 : index
    %c0_86 = arith.constant 0 : index
    %73 = vector.load %arg3[%c1_83, %c4_84, %c0_85, %c0_86] : memref<3x5x32x32xf32, #tpu.memory_space<vmem>>, vector<1x1x32x32xf32>
    %74 = vector.shape_cast %73 : vector<1x1x32x32xf32> to vector<32x32xf32>
    %cst_87 = arith.constant dense<0.000000e+00> : vector<8x32xf32>
    %75 = tpu.matmul %72, %74, %cst_87 {dimension_numbers = #tpu.dot_dimension_numbers<[1], [0], [0], [1], [0, 0, 1, 1], [], []>} : vector<8x32xf32>, vector<32x32xf32>, vector<8x32xf32> -> vector<8x32xf32>
    %76 = arith.addf %71, %75 : vector<8x32xf32>
    %c1_88 = arith.constant 1 : index
    %c0_89 = arith.constant 0 : index
    %c0_90 = arith.constant 0 : index
    %77 = vector.load %arg4[%c1_88, %c0_89, %c0_90] : memref<3x1x32xf32, #tpu.memory_space<vmem>>, vector<1x1x32xf32>
    %78 = vector.shape_cast %77 : vector<1x1x32xf32> to vector<1x32xf32>
    %79 = vector.broadcast %78 : vector<1x32xf32> to vector<8x32xf32>
    %80 = arith.mulf %76, %79 : vector<8x32xf32>
    %c1_91 = arith.constant 1 : index
    %c0_92 = arith.constant 0 : index
    %c0_93 = arith.constant 0 : index
    %81 = vector.load %arg5[%c1_91, %c0_92, %c0_93] : memref<3x1x32xf32, #tpu.memory_space<vmem>>, vector<1x1x32xf32>
    %82 = vector.shape_cast %81 : vector<1x1x32xf32> to vector<1x32xf32>
    %83 = vector.broadcast %82 : vector<1x32xf32> to vector<8x32xf32>
    %84 = arith.addf %80, %83 : vector<8x32xf32>
    %cst_94 = arith.constant 0.000000e+00 : f32
    %85 = vector.broadcast %cst_94 : f32 to vector<8x32xf32>
    %86 = arith.maximumf %84, %85 : vector<8x32xf32>
    %c2_95 = arith.constant 2 : index
    %c0_96 = arith.constant 0 : index
    %87 = vector.load %arg7[%c2_95, %c0_96] : memref<12x32xf32, #tpu.memory_space<vmem>>, vector<8x32xf32>
    %88 = arith.addf %86, %87 : vector<8x32xf32>
    %c2_97 = arith.constant 2 : index
    %c0_98 = arith.constant 0 : index
    %89 = vector.load %arg7[%c2_97, %c0_98] : memref<12x32xf32, #tpu.memory_space<vmem>>, vector<8x32xf32>
    tpu.vector_store %arg7[%c2_97, %c0_98], %88 {strides = array<i32>} : memref<12x32xf32, #tpu.memory_space<vmem>>, vector<8x32xf32>,
    %cst_99 = arith.constant 0.000000e+00 : f32
    %90 = vector.broadcast %cst_99 : f32 to vector<8x32xf32>
    %c0_100 = arith.constant 0 : index
    %c0_101 = arith.constant 0 : index
    %91 = vector.load %arg7[%c0_100, %c0_101] : memref<12x32xf32, #tpu.memory_space<vmem>>, vector<8x32xf32>
    %c2_102 = arith.constant 2 : index
    %c0_103 = arith.constant 0 : index
    %c0_104 = arith.constant 0 : index
    %c0_105 = arith.constant 0 : index
    %92 = vector.load %arg3[%c2_102, %c0_103, %c0_104, %c0_105] : memref<3x5x32x32xf32, #tpu.memory_space<vmem>>, vector<1x1x32x32xf32>
    %93 = vector.shape_cast %92 : vector<1x1x32x32xf32> to vector<32x32xf32>
    %cst_106 = arith.constant dense<0.000000e+00> : vector<8x32xf32>
    %94 = tpu.matmul %91, %93, %cst_106 {dimension_numbers = #tpu.dot_dimension_numbers<[1], [0], [0], [1], [0, 0, 1, 1], [], []>} : vector<8x32xf32>, vector<32x32xf32>, vector<8x32xf32> -> vector<8x32xf32>
    %95 = arith.addf %90, %94 : vector<8x32xf32>
    %c1_107 = arith.constant 1 : index
    %c0_108 = arith.constant 0 : index
    %96 = vector.load %arg7[%c1_107, %c0_108] : memref<12x32xf32, #tpu.memory_space<vmem>>, vector<8x32xf32>
    %c2_109 = arith.constant 2 : index
    %c1_110 = arith.constant 1 : index
    %c0_111 = arith.constant 0 : index
    %c0_112 = arith.constant 0 : index
    %97 = vector.load %arg3[%c2_109, %c1_110, %c0_111, %c0_112] : memref<3x5x32x32xf32, #tpu.memory_space<vmem>>, vector<1x1x32x32xf32>
    %98 = vector.shape_cast %97 : vector<1x1x32x32xf32> to vector<32x32xf32>
    %cst_113 = arith.constant dense<0.000000e+00> : vector<8x32xf32>
    %99 = tpu.matmul %96, %98, %cst_113 {dimension_numbers = #tpu.dot_dimension_numbers<[1], [0], [0], [1], [0, 0, 1, 1], [], []>} : vector<8x32xf32>, vector<32x32xf32>, vector<8x32xf32> -> vector<8x32xf32>
    %100 = arith.addf %95, %99 : vector<8x32xf32>
    %c2_114 = arith.constant 2 : index
    %c0_115 = arith.constant 0 : index
    %101 = vector.load %arg7[%c2_114, %c0_115] : memref<12x32xf32, #tpu.memory_space<vmem>>, vector<8x32xf32>
    %c2_116 = arith.constant 2 : index
    %c2_117 = arith.constant 2 : index
    %c0_118 = arith.constant 0 : index
    %c0_119 = arith.constant 0 : index
    %102 = vector.load %arg3[%c2_116, %c2_117, %c0_118, %c0_119] : memref<3x5x32x32xf32, #tpu.memory_space<vmem>>, vector<1x1x32x32xf32>
    %103 = vector.shape_cast %102 : vector<1x1x32x32xf32> to vector<32x32xf32>
    %cst_120 = arith.constant dense<0.000000e+00> : vector<8x32xf32>
    %104 = tpu.matmul %101, %103, %cst_120 {dimension_numbers = #tpu.dot_dimension_numbers<[1], [0], [0], [1], [0, 0, 1, 1], [], []>} : vector<8x32xf32>, vector<32x32xf32>, vector<8x32xf32> -> vector<8x32xf32>
    %105 = arith.addf %100, %104 : vector<8x32xf32>
    %c3_121 = arith.constant 3 : index
    %c0_122 = arith.constant 0 : index
    %106 = vector.load %arg7[%c3_121, %c0_122] : memref<12x32xf32, #tpu.memory_space<vmem>>, vector<8x32xf32>
    %c2_123 = arith.constant 2 : index
    %c3_124 = arith.constant 3 : index
    %c0_125 = arith.constant 0 : index
    %c0_126 = arith.constant 0 : index
    %107 = vector.load %arg3[%c2_123, %c3_124, %c0_125, %c0_126] : memref<3x5x32x32xf32, #tpu.memory_space<vmem>>, vector<1x1x32x32xf32>
    %108 = vector.shape_cast %107 : vector<1x1x32x32xf32> to vector<32x32xf32>
    %cst_127 = arith.constant dense<0.000000e+00> : vector<8x32xf32>
    %109 = tpu.matmul %106, %108, %cst_127 {dimension_numbers = #tpu.dot_dimension_numbers<[1], [0], [0], [1], [0, 0, 1, 1], [], []>} : vector<8x32xf32>, vector<32x32xf32>, vector<8x32xf32> -> vector<8x32xf32>
    %110 = arith.addf %105, %109 : vector<8x32xf32>
    %c4_128 = arith.constant 4 : index
    %c0_129 = arith.constant 0 : index
    %111 = vector.load %arg7[%c4_128, %c0_129] : memref<12x32xf32, #tpu.memory_space<vmem>>, vector<8x32xf32>
    %c2_130 = arith.constant 2 : index
    %c4_131 = arith.constant 4 : index
    %c0_132 = arith.constant 0 : index
    %c0_133 = arith.constant 0 : index
    %112 = vector.load %arg3[%c2_130, %c4_131, %c0_132, %c0_133] : memref<3x5x32x32xf32, #tpu.memory_space<vmem>>, vector<1x1x32x32xf32>
    %113 = vector.shape_cast %112 : vector<1x1x32x32xf32> to vector<32x32xf32>
    %cst_134 = arith.constant dense<0.000000e+00> : vector<8x32xf32>
    %114 = tpu.matmul %111, %113, %cst_134 {dimension_numbers = #tpu.dot_dimension_numbers<[1], [0], [0], [1], [0, 0, 1, 1], [], []>} : vector<8x32xf32>, vector<32x32xf32>, vector<8x32xf32> -> vector<8x32xf32>
    %115 = arith.addf %110, %114 : vector<8x32xf32>
    %c2_135 = arith.constant 2 : index
    %c0_136 = arith.constant 0 : index
    %c0_137 = arith.constant 0 : index
    %116 = vector.load %arg4[%c2_135, %c0_136, %c0_137] : memref<3x1x32xf32, #tpu.memory_space<vmem>>, vector<1x1x32xf32>
    %117 = vector.shape_cast %116 : vector<1x1x32xf32> to vector<1x32xf32>
    %118 = vector.broadcast %117 : vector<1x32xf32> to vector<8x32xf32>
    %119 = arith.mulf %115, %118 : vector<8x32xf32>
    %c2_138 = arith.constant 2 : index
    %c0_139 = arith.constant 0 : index
    %c0_140 = arith.constant 0 : index
    %120 = vector.load %arg5[%c2_138, %c0_139, %c0_140] : memref<3x1x32xf32, #tpu.memory_space<vmem>>, vector<1x1x32xf32>
    %121 = vector.shape_cast %120 : vector<1x1x32xf32> to vector<1x32xf32>
    %122 = vector.broadcast %121 : vector<1x32xf32> to vector<8x32xf32>
    %123 = arith.addf %119, %122 : vector<8x32xf32>
    %cst_141 = arith.constant 0.000000e+00 : f32
    %124 = vector.broadcast %cst_141 : f32 to vector<8x32xf32>
    %125 = arith.maximumf %123, %124 : vector<8x32xf32>
    %c2_142 = arith.constant 2 : index
    %c0_143 = arith.constant 0 : index
    %126 = vector.load %arg7[%c2_142, %c0_143] : memref<12x32xf32, #tpu.memory_space<vmem>>, vector<8x32xf32>
    %127 = arith.addf %125, %126 : vector<8x32xf32>
    %c2_144 = arith.constant 2 : index
    %c0_145 = arith.constant 0 : index
    %128 = vector.load %arg7[%c2_144, %c0_145] : memref<12x32xf32, #tpu.memory_space<vmem>>, vector<8x32xf32>
    tpu.vector_store %arg7[%c2_144, %c0_145], %127 {strides = array<i32>} : memref<12x32xf32, #tpu.memory_space<vmem>>, vector<8x32xf32>,
    %c2_146 = arith.constant 2 : index
    %c0_147 = arith.constant 0 : index
    %129 = vector.load %arg7[%c2_146, %c0_147] : memref<12x32xf32, #tpu.memory_space<vmem>>, vector<8x32xf32>
    %c0_148 = arith.constant 0 : index
    %c0_149 = arith.constant 0 : index
    %c0_150 = arith.constant 0 : index
    %130 = vector.load %arg6[%c0_148, %c0_149, %c0_150] : memref<1x8x32xf32, #tpu.memory_space<vmem>>, vector<1x8x32xf32>
    %131 = vector.shape_cast %130 : vector<1x8x32xf32> to vector<8x32xf32>
    %132 = vector.shape_cast %129 : vector<8x32xf32> to vector<1x8x32xf32>
    tpu.vector_store %arg6[%c0_148, %c0_149, %c0_150], %132 {strides = array<i32>} : memref<1x8x32xf32, #tpu.memory_space<vmem>>, vector<1x8x32xf32>,
    return
  }
  func.func @transform_0(%arg0: i32) -> (i32, i32, i32) {
    %c0_i32 = arith.constant 0 : i32
    %c0_i32_0 = arith.constant 0 : i32
    %c0_i32_1 = arith.constant 0 : i32
    return %arg0, %c0_i32, %c0_i32_0 : i32, i32, i32
  }
  func.func @transform_1(%arg0: i32) -> (i32, i32) {
    %c0_i32 = arith.constant 0 : i32
    %c0_i32_0 = arith.constant 0 : i32
    %c0_i32_1 = arith.constant 0 : i32
    return %c0_i32, %c0_i32_0 : i32, i32
  }
  func.func @transform_2(%arg0: i32) -> (i32, i32, i32, i32) {
    %c0_i32 = arith.constant 0 : i32
    %c0_i32_0 = arith.constant 0 : i32
    %c0_i32_1 = arith.constant 0 : i32
    %c0_i32_2 = arith.constant 0 : i32
    %c0_i32_3 = arith.constant 0 : i32
    return %c0_i32, %c0_i32_0, %c0_i32_1, %c0_i32_2 : i32, i32, i32, i32
  }
  func.func @transform_3(%arg0: i32) -> (i32, i32, i32) {
    %c0_i32 = arith.constant 0 : i32
    %c0_i32_0 = arith.constant 0 : i32
    %c0_i32_1 = arith.constant 0 : i32
    %c0_i32_2 = arith.constant 0 : i32
    return %c0_i32, %c0_i32_0, %c0_i32_1 : i32, i32, i32
  }
  func.func @transform_4(%arg0: i32) -> (i32, i32, i32) {
    %c0_i32 = arith.constant 0 : i32
    %c0_i32_0 = arith.constant 0 : i32
    %c0_i32_1 = arith.constant 0 : i32
    %c0_i32_2 = arith.constant 0 : i32
    return %c0_i32, %c0_i32_0, %c0_i32_1 : i32, i32, i32
  }
  func.func @transform_5(%arg0: i32) -> (i32, i32, i32) {
    %c0_i32 = arith.constant 0 : i32
    %c0_i32_0 = arith.constant 0 : i32
    %c0_i32_1 = arith.constant 0 : i32
    return %arg0, %c0_i32, %c0_i32_0 : i32, i32, i32
  }
}

</mosaic_0001>

<bundles_post_ra>
// kernel: tpu_custom_call.1
= control target key start
LH: loop header
LB: loop body
LE: loop exit
PB: predicated region body
PF: predicated region fallthrough
CT: control target
= control target key end

     0   :  { %10 = vsyncpa [#allocation4], 0  ;;  %s1231_s0 = inlined_call_operand.vmem [shape: s32[2,8,1], index: 0, kind: input, shape index: {}]   ;;  %s1232_s1 = inlined_call_operand.vmem [shape: f32[40,32], index: 1, kind: input, shape index: {}]   ;;  %s1233_s2 = inlined_call_operand.hbm [shape: f32[3,5,32,32], index: 2, kind: input, shape index: {}]   ;;  %s1234_s3 = inlined_call_operand.vmem [shape: f32[3,1,32], index: 3, kind: input, shape index: {}]   ;;  %s1235_s4 = inlined_call_operand.vmem [shape: f32[3,1,32], index: 4, kind: input, shape index: {}]   ;;  %s1236_s5 = inlined_call_operand.hbm [shape: f32[2,8,32], index: 5, kind: output, shape index: {}]  }
   0x1   :  { %11 = vsyncpa [#allocation5], 0 }
   0x2   :  { %13 = vsyncpa [#allocation5 + $0x1], 0  ;;  %s1082_s18 = smov 0   ;;  %s1084_s19 = smov 0  }
   0x3   :  { %s1086_s20 = smov 0   ;;  %s1088_s21 = smov 0  }
   0x4 LB: > { %s1103_s22 = sadd.s32 4294967295, %s1045_s21   ;;  %s855_s23 = sadd.s32 4294967294, %s1045_s21   ;;  %s1045_s21 = sphi %s1088_s21, %s1242_s21   ;;  %s1041_s20 = sphi %s1086_s20, %s1241_s20   ;;  %s1037_s19 = sphi %s1084_s19, %s1240_s19   ;;  %s1033_s18 = sphi %s1082_s18, %s1239_s18  }
   0x5   : > { %s1107_s24 = sadd.s32 1, %s1045_s21   ;;  %s136_s25 = sadd.s32 1, %s1041_s20 }
   0x6   : > { %s133_s26 = ssub.s32 %s1045_s21, %s1107_s24  ;;  %p146_p0 = scmp.ne.s32.totalorder %s1041_s20, %s1037_s19 }
   0x7   : > { %p134_p1 = scmp.eq.s32.totalorder %s133_s26, 0  ;;  %p147_p2 = scmp.eq.s32.totalorder %s1103_s22, 1 }
   0x8   : > { %p152_p3 = scmp.ne.s32.totalorder %s1037_s19, %s1033_s18  ;;  %p153_p4 = scmp.eq.s32.totalorder %s855_s23, 1 }
   0x9   : > { %s1118_s27 = scalar_select %p134_p1, %s1041_s20, %s136_s25  }
   0xa   : > { %p1120_p5 = por %p147_p2, %p146_p0  ;;  %p1124_p6 = por %p153_p4, %p152_p3 }
   0xb   : > { %p856_p7 = scmp.ge.s32.totalorder %s1045_s21, 1  ;;  %p160_p8 = scmp.lt.s32.totalorder %s1045_s21, 3 }
   0xc   : > { %p902_p9 = scmp.eq.s32.totalorder %s1103_s22, 0  ;;  %s174_s7 = sshll.u32 %s1233_s2, 4  ;;  %s175_s7 = int_to_ptr.hbm [resolvable:$true] %s174_s7 }
   0xd   : > { %p161_p10 = pnand %p856_p7, %p160_p8  ;;  %s1047_s8 = smov [#allocation3]  }
   0xe   : > { %s176_s9 = sshll.u32 %s1047_s8, 4  ;;  %s1048_s10 = smov 128   ;;  %s177_s9 = int_to_ptr.vmem [resolvable:$true] %s176_s9 }
   0xf   : > { %p894_p11 = pneg %p161_p10  ;;  %s1049_s11 = smov 8  }
  0x10   : > { %205 = sbr.rel (%p161_p10) target bundleno = 756 (0x2f4), region = 40 }
  0x11   : > { %p895_p12 = pnand %p902_p9, %p894_p11 }
  0x13   : > { %897 = dma.hbm_to_vmem [thread:$0]  (!%p895_p12), %s175_s7, 7680, %s177_s9, [#allocation4], %s1048_s10, %s1048_s10, %s1049_s11  }
  0x15   : > { %1024 = dma.done.wait (%p902_p9), [#allocation4], 7680  }
  0x16   : > { %1026 = vsyncadd (%p902_p9), [#allocation4], 4294959616  ;;  %p233_p13 = scmp.lt.s32.totalorder %s1103_s22, 1  ;;  %vm275_vm0 = vcmask 261120   ;;  %v1050_v0 = vmov 0   ;;  %v1051_v1 = vmov 0.0   ;;  %v238_v8 = vlaneseq }
  0x17   : > { %942 = vset.pattern.permute.xlu0 %v1050_v0  ;;  %276 = vst.msk [vmem:[#allocation2] sm:$0xff] %vm275_vm0, %v1051_v1  ;;  %vm277_vm1 = vcmask 257024   ;;  %v250_v3 = vld [vmem:[%s1232_s1 + $0x20] sm:$0xff]  ;;  %v249_v4 = vld [vmem:[%s1232_s1 + $0x18] sm:$0xff]  ;;  %v248_v5 = vld [vmem:[%s1232_s1 + $0x10] sm:$0xff]  ;;  %vm251_vm2 = vcmask 326656  }
  0x18   : > { %s234_s12 = scalar_select %p233_p13, %s1103_s22, 1  ;;  %278 = vst.msk [vmem:[#allocation2 + $0x8] sm:$0xf] %vm277_vm1, %v1051_v1  ;;  %266 = vmatpush.msra.mxu0 %v250_v3  ;;  %v247_v6 = vld [vmem:[%s1232_s1 + $0x8] sm:$0xff]  ;;  %v246_v7 = vld [vmem:[%s1232_s1] sm:$0xff]  ;;  %v239_v9 = vand.u32 127, %v238_v8 }
  0x19   : > { %v290_v12 = vld [vmem:[#allocation3 + $0x38] sm:$0xff]  ;;  %v289_v15 = vld [vmem:[#allocation3 + $0x30] sm:$0xff]  ;;  %v288_v18 = vld [vmem:[#allocation3 + $0x28] sm:$0xff]  ;;  %s230_s7 = sand.u32 1, %s1037_s19   ;;  %s885_s9 = sshll.u32 %s1103_s22, 3 }
  0x1a   : > { %s862_s13 = sshll.u32 %s234_s12, 3  ;;  %267 = vmatpush.msra.mxu0 %v249_v4  ;;  %v284_v13 = vld [vmem:[#allocation3 + $0x18] sm:$0xff]  ;;  %306 = vmatpush.msra.mxu1 %v290_v12  ;;  %v283_v16 = vld [vmem:[#allocation3 + $0x10] sm:$0xff]  ;;  %v282_v19 = vld [vmem:[#allocation3 + $0x8] sm:$0xff]  ;;  %s861_s8 = sshll.u32 %s230_s7, 3 }
  0x1b   : > { %s236_s16 = scalar_lea.vmem %s1231_s0, %s862_s13  ;;  %v342_v14 = vld [vmem:[#allocation3 + $0x58] sm:$0xff]  ;;  %329 = vmatpush.msra.mxu2 %v284_v13  ;;  %v341_v17 = vld [vmem:[#allocation3 + $0x50] sm:$0xff]  ;;  %v340_v20 = vld [vmem:[#allocation3 + $0x48] sm:$0xff]  ;;  %s779_s12 = scalar_lea.hbm %s1236_s5, %s885_s9 }
  0x1c   : > { %v237_v2 = vld [vmem:[%s236_s16] sm:$0xff]  ;;  %268 = vmatpush.msra.mxu0 %v248_v5  ;;  %358 = vmatpush.msra.mxu3 %v342_v14  ;;  %v287_v21 = vld [vmem:[#allocation3 + $0x20] sm:$0xff]  ;;  %v402_v24 = vld [vmem:[#allocation3 + $0x98] sm:$0xff]  ;;  %s232_s13 = scalar_lea.vmem [#allocation6], %s861_s8  ;;  %s783_s15 = sshll.u32 %s779_s12, 4  ;;  %s784_s15 = int_to_ptr.hbm [resolvable:$true] %s783_s15 }
  0x1d   : > { %241 = vperm.xlu0 %942, %v237_v2   ;;  %307 = vmatpush.msra.mxu1 %v289_v15  ;;  %v281_v22 = vld [vmem:[#allocation3] sm:$0xff]  ;;  %v372_v25 = vld [vmem:[#allocation3 + $0x78] sm:$0xff]  ;;  %v401_v26 = vld [vmem:[#allocation3 + $0x90] sm:$0xff]  ;;  %s781_s14 = sshll.u32 %s232_s13, 4  ;;  %s769_s16 = scalar_lea.sflag [#allocation5], %s230_s7  ;;  %s782_s14 = int_to_ptr.vmem [resolvable:$true] %s781_s14 }
  0x1e   : > { %269 = vmatpush.msra.mxu0 %v247_v6  ;;  %330 = vmatpush.msra.mxu2 %v283_v16  ;;  %v339_v23 = vld [vmem:[#allocation3 + $0x40] sm:$0xff]  ;;  %v371_v27 = vld [vmem:[#allocation3 + $0x70] sm:$0xff]  ;;  %v400_v28 = vld [vmem:[#allocation3 + $0x88] sm:$0xff]  ;;  %s993_s17 = sshra.s32 %s784_s15, 4  ;;  %s999_s26 = scalar_lea.hbm %s1236_s5, 16  ;;  %s994_s17 = int_to_ptr.hbm [resolvable:$true] %s993_s17 }
  0x1f   : > { %359 = vmatpush.msra.mxu3 %v341_v17  ;;  %308 = vmatpush.msra.mxu1 %v288_v18  ;;  %v370_v29 = vld [vmem:[#allocation3 + $0x68] sm:$0xff]  ;;  %v399_v30 = vld [vmem:[#allocation3 + $0x80] sm:$0xff]  ;;  %v451_v38 = vld [vmem:[#allocation3 + $0xd8] sm:$0xff]  ;;  %s995_s22 = scalar_lea.hbm %s994_s17, 8  ;;  %p1000_p3 = scmp.lt.s32.totalorder %s994_s17, %s1236_s5 }
  0x20   : > { %270 = vmatpush.msra.mxu0 %v246_v7  ;;  %331 = vmatpush.msra.mxu2 %v282_v19  ;;  %v369_v31 = vld [vmem:[#allocation3 + $0x60] sm:$0xff]  ;;  %v445_v39 = vld [vmem:[#allocation3 + $0xb8] sm:$0xff]  ;;  %v450_v42 = vld [vmem:[#allocation3 + $0xd0] sm:$0xff]  ;;  %p996_p0 = scmp.ne.s32.totalorder %s994_s17, %s995_s22  ;;  %p1001_p4 = scmp.lt.s32.totalorder %s999_s26, %s995_s22 }
  0x21   : > { %360 = vmatpush.msra.mxu3 %v340_v20  ;;  %309 = vmatpush.msra.mxu1 %v287_v21  ;;  %v503_v40 = vld [vmem:[#allocation3 + $0xf8] sm:$0xff]  ;;  %v444_v43 = vld [vmem:[#allocation3 + $0xb0] sm:$0xff]  ;;  %v449_v46 = vld [vmem:[#allocation3 + $0xc8] sm:$0xff] }
  0x22   : > { %332 = vmatpush.msra.mxu2 %v281_v22  ;;  %490 = vmatpush.msrb.mxu0 %v445_v39  ;;  %v533_v41 = vld [vmem:[#allocation3 + $0x118] sm:$0xff]  ;;  %v502_v44 = vld [vmem:[#allocation3 + $0xf0] sm:$0xff]  ;;  %v443_v47 = vld [vmem:[#allocation3 + $0xa8] sm:$0xff]  ;;  %p997_p1 = pnand %p996_p0, %p1120_p5  ;;  %p1002_p7 = por %p1001_p4, %p1000_p3 }
  0x23   : > { %361 = vmatpush.msra.mxu3 %v339_v23  ;;  %388 = vmatpush.msrb.mxu1 %v372_v25  ;;  %v532_v45 = vld [vmem:[#allocation3 + $0x110] sm:$0xff]  ;;  %v501_v48 = vld [vmem:[#allocation3 + $0xe8] sm:$0xff]  ;;  %v448_v50 = vld [vmem:[#allocation3 + $0xc0] sm:$0xff] }
  0x24   : > { %418 = vmatpush.msrb.mxu2 %v402_v24  ;;  %491 = vmatpush.msrb.mxu0 %v444_v43  ;;  %v531_v49 = vld [vmem:[#allocation3 + $0x108] sm:$0xff]  ;;  %v442_v51 = vld [vmem:[#allocation3 + $0xa0] sm:$0xff]  ;;  %v563_v55 = vld [vmem:[#allocation3 + $0x138] sm:$0xff]  ;;  %p998_p2 = pneg %p997_p1 }
  0x25   : > { %389 = vmatpush.msrb.mxu1 %v371_v27  ;;  %467 = vmatpush.msrb.mxu3 %v451_v38  ;;  %v500_v52 = vld [vmem:[#allocation3 + $0xe0] sm:$0xff]  ;;  %v562_v56 = vld [vmem:[#allocation3 + $0x130] sm:$0xff]  ;;  %v561_v57 = vld [vmem:[#allocation3 + $0x128] sm:$0xff] }
  0x26   : > { %419 = vmatpush.msrb.mxu2 %v401_v26  ;;  %492 = vmatpush.msrb.mxu0 %v443_v47  ;;  %v530_v53 = vld [vmem:[#allocation3 + $0x100] sm:$0xff]  ;;  %v944_v4 = vld [vmem:[%s1235_s4] ss:$0 sm:$0xff]  ;;  %v666_v14 = vld [vmem:[#allocation3 + $0x198] sm:$0xff]  ;;  %p1003_p8 = pnand %p1002_p7, %p998_p2 }
  0x27   : > { %390 = vmatpush.msrb.mxu1 %v370_v29  ;;  %468 = vmatpush.msrb.mxu3 %v450_v42  ;;  %v560_v59 = vld [vmem:[#allocation3 + $0x120] sm:$0xff]  ;;  %v614_v15 = vld [vmem:[#allocation3 + $0x178] sm:$0xff]  ;;  %v665_v18 = vld [vmem:[#allocation3 + $0x190] sm:$0xff] }
  0x28   : > { %420 = vmatpush.msrb.mxu2 %v400_v28  ;;  %493 = vmatpush.msrb.mxu0 %v442_v51  ;;  %v608_v16 = vld [vmem:[#allocation3 + $0x158] sm:$0xff]  ;;  %v613_v19 = vld [vmem:[#allocation3 + $0x170] sm:$0xff]  ;;  %v664_v22 = vld [vmem:[#allocation3 + $0x188] sm:$0xff] }
  0x29   : > { %391 = vmatpush.msrb.mxu1 %v369_v31  ;;  %469 = vmatpush.msrb.mxu3 %v449_v46  ;;  %v696_v17 = vld [vmem:[#allocation3 + $0x1b8] sm:$0xff]  ;;  %v607_v20 = vld [vmem:[#allocation3 + $0x150] sm:$0xff]  ;;  %v612_v23 = vld [vmem:[#allocation3 + $0x168] sm:$0xff] }
  0x2a   : > { %421 = vmatpush.msrb.mxu2 %v399_v30  ;;  %v695_v21 = vld [vmem:[#allocation3 + $0x1b0] sm:$0xff]  ;;  %v606_v24 = vld [vmem:[#allocation3 + $0x148] sm:$0xff]  ;;  %v663_v26 = vld [vmem:[#allocation3 + $0x180] sm:$0xff] }
  0x2b   : > { %470 = vmatpush.msrb.mxu3 %v448_v50  ;;  %v694_v25 = vld [vmem:[#allocation3 + $0x1a8] sm:$0xff]  ;;  %v611_v27 = vld [vmem:[#allocation3 + $0x160] sm:$0xff]  ;;  %v726_v30 = vld [vmem:[#allocation3 + $0x1d8] sm:$0xff] }
  0x2c   : > { %v605_v28 = vld [vmem:[#allocation3 + $0x140] sm:$0xff]  ;;  %v725_v31 = vld [vmem:[#allocation3 + $0x1d0] sm:$0xff] }
  0x2d   : > { %v693_v29 = vld [vmem:[#allocation3 + $0x1a0] sm:$0xff] }
  0x8f   : > { %v242_v10 = vpop.permute.xlu0 %241 }
  0x90   : > { %vm243_vm3 = vcmp.eq.s32.totalorder %v239_v9, %v242_v10 }
  0x91   : > { %v863_v11 = vsel %vm243_vm3, 1.0, %v1051_v1  ;;  %v943_v1 = vld [vmem:[%s1234_s3] ss:$0 sm:$0xff] }
  0x92   : > { %864 = vmatmul.msk.f32.vlgmr.msra.gmra.mxu0 %vm251_vm2, %v863_v11 }
  0x93   : > { %630 = vmatpush.msra.mxu0 %v614_v15 }
  0x95   : > { %631 = vmatpush.msra.mxu0 %v613_v19 }
  0x97   : > { %632 = vmatpush.msra.mxu0 %v612_v23 }
  0x99   : > { %633 = vmatpush.msra.mxu0 %v611_v27 }
 0x10f   : > { %v272_v32 = vpop.f32.mrf.mxu0 }
 0x110   : > { %279 = vst.msk [vmem:[#allocation2 + $0x2] sm:$0xff] %vm275_vm0, %v272_v32  ;;  %v724_v32 = vld [vmem:[#allocation3 + $0x1c8] sm:$0xff] }
 0x117   : > { %v285_v33 = vld [vmem:[#allocation2 + $0x1] sm:$0xff] }
 0x118   : > { %v280_v34 = vld [vmem:[#allocation2] sm:$0xff]  ;;  %865 = vmatmul.msk.f32.vlgmr.msra.gmra.mxu1 %vm275_vm0, %v285_v33 }
 0x119   : > { %v337_v35 = vld [vmem:[#allocation2 + $0x2] sm:$0xff]  ;;  %866 = vmatmul.msk.f32.vlgmr.msra.gmra.mxu2 %vm275_vm0, %v280_v34  ;;  %519 = vmatpush.msra.mxu1 %v503_v40 }
 0x11a   : > { %867 = vmatmul.msk.f32.vlgmr.msra.gmra.mxu3 %vm275_vm0, %v337_v35  ;;  %v367_v36 = vld [vmem:[#allocation2 + $0x3] sm:$0xff]  ;;  %549 = vmatpush.msra.mxu2 %v533_v41  ;;  %v945_v41 = vld [vmem:[%s1234_s3 + $0x1] ss:$0 sm:$0xff] }
 0x11b   : > { %v397_v37 = vld [vmem:[#allocation2 + $0x4] sm:$0xff]  ;;  %520 = vmatpush.msra.mxu1 %v502_v44  ;;  %579 = vmatpush.msra.mxu3 %v563_v55  ;;  %v946_v44 = vld [vmem:[%s1235_s4 + $0x1] ss:$0 sm:$0xff] }
 0x11c   : > { %550 = vmatpush.msra.mxu2 %v532_v45 }
 0x11d   : > { %521 = vmatpush.msra.mxu1 %v501_v48  ;;  %580 = vmatpush.msra.mxu3 %v562_v56 }
 0x11e   : > { %551 = vmatpush.msra.mxu2 %v531_v49 }
 0x11f   : > { %522 = vmatpush.msra.mxu1 %v500_v52  ;;  %581 = vmatpush.msra.mxu3 %v561_v57 }
 0x120   : > { %868 = vmatmul.msk.f32.vlgmr.msrb.gmra.mxu1 %vm275_vm0, %v367_v36  ;;  %552 = vmatpush.msra.mxu2 %v530_v53 }
 0x121   : > { %869 = vmatmul.msk.f32.vlgmr.msrb.gmra.mxu2 %vm275_vm0, %v397_v37  ;;  %582 = vmatpush.msra.mxu3 %v560_v59 }
 0x122   : > { %682 = vmatpush.msrb.mxu2 %v666_v14  ;;  %653 = vmatpush.msrb.mxu1 %v608_v16 }
 0x124   : > { %683 = vmatpush.msrb.mxu2 %v665_v18  ;;  %654 = vmatpush.msrb.mxu1 %v607_v20 }
 0x126   : > { %684 = vmatpush.msrb.mxu2 %v664_v22  ;;  %655 = vmatpush.msrb.mxu1 %v606_v24 }
 0x128   : > { %685 = vmatpush.msrb.mxu2 %v663_v26  ;;  %656 = vmatpush.msrb.mxu1 %v605_v28 }
 0x195   : > { %v311_v54 = vpop.f32.mrf.mxu1 }
 0x19c   : > { %v334_v58 = vpop.f32.mrf.mxu2 }
 0x19d   : > { %v335_v60 = vadd.f32 %v334_v58, %v311_v54  ;;  %v363_v61 = vpop.f32.mrf.mxu3  ;;  %v393_v63 = vpop.f32.mrf.mxu1 }
 0x19f   : > { %v366_v62 = vadd.f32 %v363_v61, %v335_v60  ;;  %v947_v61 = vld [vmem:[%s1234_s3 + $0x2] ss:$0 sm:$0xff] }
 0x1a1   : > { %v396_v0 = vadd.f32 %v393_v63, %v366_v62 }
 0x1a4   : > { %v423_v2 = vpop.f32.mrf.mxu2 }
 0x1a5   : > { %v426_v3 = vadd.f32 %v423_v2, %v396_v0  ;;  %v948_v0 = vld [vmem:[%s1235_s4 + $0x2] ss:$0 sm:$0xff] }
 0x1a7   : > { %v431_v5 = vmul.f32 %v943_v1, %v426_v3 }
 0x1a9   : > { %v436_v6 = vadd.f32 %v944_v4, %v431_v5 }
 0x1ab   : > { %v437_v7 = vmax.f32 %v436_v6, 0.0 }
 0x1ad   : > { %v438_v8 = vadd.f32 %v437_v7, %v337_v35  ;;  %v723_v35 = vld [vmem:[#allocation3 + $0x1c0] sm:$0xff] }
 0x1af   : > { %439 = vst.msk [vmem:[#allocation2 + $0x2] sm:$0xff] %vm275_vm0, %v438_v8 }
 0x1b6   : > { %v446_v9 = vld [vmem:[#allocation2 + $0x1] sm:$0xff] }
 0x1b7   : > { %v440_v10 = vld [vmem:[#allocation2] sm:$0xff]  ;;  %870 = vmatmul.msk.f32.vlgmr.msrb.gmra.mxu3 %vm275_vm0, %v446_v9 }
 0x1b8   : > { %v498_v11 = vld [vmem:[#allocation2 + $0x2] sm:$0xff]  ;;  %871 = vmatmul.msk.f32.vlgmr.msrb.gmra.mxu0 %vm275_vm0, %v440_v10  ;;  %712 = vmatpush.msrb.mxu3 %v696_v17 }
 0x1b9   : > { %v528_v12 = vld [vmem:[#allocation2 + $0x3] sm:$0xff]  ;;  %872 = vmatmul.msk.f32.vlgmr.msra.gmra.mxu1 %vm275_vm0, %v498_v11  ;;  %742 = vmatpush.msrb.mxu0 %v726_v30 }
 0x1ba   : > { %873 = vmatmul.msk.f32.vlgmr.msra.gmra.mxu2 %vm275_vm0, %v528_v12  ;;  %v558_v13 = vld [vmem:[#allocation2 + $0x4] sm:$0xff]  ;;  %713 = vmatpush.msrb.mxu3 %v695_v21 }
 0x1bb   : > { %743 = vmatpush.msrb.mxu0 %v725_v31 }
 0x1bc   : > { %714 = vmatpush.msrb.mxu3 %v694_v25 }
 0x1bd   : > { %744 = vmatpush.msrb.mxu0 %v724_v32 }
 0x1be   : > { %715 = vmatpush.msrb.mxu3 %v693_v29 }
 0x1bf   : > { %874 = vmatmul.msk.f32.vlgmr.msra.gmra.mxu3 %vm275_vm0, %v558_v13  ;;  %745 = vmatpush.msrb.mxu0 %v723_v35 }
 0x235   : > { %v495_v33 = vpop.f32.mrf.mxu0 }
 0x236   : > { %v524_v37 = vpop.f32.mrf.mxu1 }
 0x23a   : > { %v472_v34 = vpop.f32.mrf.mxu3 }
 0x23b   : > { %v496_v36 = vadd.f32 %v495_v33, %v472_v34 }
 0x23d   : > { %v527_v38 = vadd.f32 %v524_v37, %v496_v36  ;;  %v554_v39 = vpop.f32.mrf.mxu2 }
 0x23f   : > { %v557_v40 = vadd.f32 %v554_v39, %v527_v38 }
 0x242   : > { %v584_v42 = vpop.f32.mrf.mxu3 }
 0x243   : > { %v587_v43 = vadd.f32 %v584_v42, %v557_v40 }
 0x245   : > { %v593_v45 = vmul.f32 %v945_v41, %v587_v43 }
 0x247   : > { %v599_v46 = vadd.f32 %v946_v44, %v593_v45 }
 0x249   : > { %v600_v47 = vmax.f32 %v599_v46, 0.0 }
 0x24b   : > { %v601_v48 = vadd.f32 %v600_v47, %v498_v11 }
 0x24d   : > { %602 = vst.msk [vmem:[#allocation2 + $0x2] sm:$0xff] %vm275_vm0, %v601_v48 }
 0x254   : > { %v609_v49 = vld [vmem:[#allocation2 + $0x1] sm:$0xff] }
 0x255   : > { %v603_v50 = vld [vmem:[#allocation2] sm:$0xff]  ;;  %877 = vmatmul.msk.f32.vlgmr.msra.gmra.mxu0 %vm275_vm0, %v609_v49 }
 0x256   : > { %v661_v51 = vld [vmem:[#allocation2 + $0x2] sm:$0xff]  ;;  %878 = vmatmul.msk.f32.vlgmr.msrb.gmra.mxu1 %vm275_vm0, %v603_v50 }
 0x257   : > { %v691_v52 = vld [vmem:[#allocation2 + $0x3] sm:$0xff]  ;;  %879 = vmatmul.msk.f32.vlgmr.msrb.gmra.mxu2 %vm275_vm0, %v661_v51 }
 0x258   : > { %880 = vmatmul.msk.f32.vlgmr.msrb.gmra.mxu3 %vm275_vm0, %v691_v52  ;;  %v721_v53 = vld [vmem:[#allocation2 + $0x4] sm:$0xff] }
 0x25d   : > { %881 = vmatmul.msk.f32.vlgmr.msrb.gmra.mxu0 %vm275_vm0, %v721_v53 }
 0x2d2   : > { %v635_v54 = vpop.f32.mrf.mxu0 }
 0x2d3   : > { %v658_v55 = vpop.f32.mrf.mxu1 }
 0x2d4   : > { %v659_v56 = vadd.f32 %v658_v55, %v635_v54 }
 0x2da   : > { %v687_v57 = vpop.f32.mrf.mxu2  ;;  %v747_v62 = vpop.f32.mrf.mxu0 }
 0x2db   : > { %v690_v58 = vadd.f32 %v687_v57, %v659_v56  ;;  %v717_v59 = vpop.f32.mrf.mxu3 }
 0x2dd   : > { %v720_v60 = vadd.f32 %v717_v59, %v690_v58 }
 0x2df   : > { %v750_v63 = vadd.f32 %v747_v62, %v720_v60 }
 0x2e1   : > { %v756_v1 = vmul.f32 %v947_v61, %v750_v63 }
 0x2e3   : > { %v762_v2 = vadd.f32 %v948_v0, %v756_v1 }
 0x2e5   : > { %v763_v3 = vmax.f32 %v762_v2, 0.0 }
 0x2e7   : > { %v764_v4 = vadd.f32 %v763_v3, %v661_v51 }
 0x2e9   : > { %765 = vst.msk [vmem:[#allocation2 + $0x2] sm:$0xff] %vm275_vm0, %v764_v4 }
 0x2f0   : > { %v766_v5 = vld [vmem:[#allocation2 + $0x2] sm:$0xff] }
 0x2f1   : > { %767 = vst.msk [vmem:[%s232_s13] sm:$0xff] %vm275_vm0, %v766_v5 }
 0x2f2   : > { %1006 = shalt.err (!%p1003_p8)
}
 0x2f3   : > { %892 = dma.vmem_to_hbm [thread:$0]  (%p1120_p5), %s782_s14, 128, %s784_s15, %s769_s16  }
 0x2f4 PF: > { %p904_p9 = scmp.ge.s32.totalorder %s1045_s21, 2  ;;  %s795_s7 = sand.u32 1, %s1033_s18  }
 0x2f5   : > { %s796_s8 = scalar_lea.sflag [#allocation5], %s795_s7 }
 0x2f6   : > { %p899_p10 = pnand %p904_p9, %p1124_p6 }
 0x2f8   : > { %p900_p11 = pneg %p899_p10 }
 0x2fa   : > { %1028 = dma.done.wait (%p900_p11), %s796_s8, 128  }
 0x2fb   : > { %1030 = vsyncadd (%p900_p11), %s796_s8, 4294967168  ;;  %p16_p12 = scmp.ge.s32.totalorder %s1107_s24, 4   ;;  %s1239_s18 = smov %s1037_s19 }
 0x2fc   : > { %s1240_s19 = smov %s1041_s20  ;;  %s1241_s20 = smov %s1118_s27 }
 0x2fd   : > { %s1242_s21 = smov %s1107_s24  ;;  %18 = sbr.rel (!%p16_p12) target bundleno = 4 (0x4), region = 98 }
 0x302   :  { %802 = vsyncpa [#allocation4], 1 }
 0x303   :  { %804 = vsyncpa [#allocation4 + $0x1], 1 }
 0x304   :  { %805 = vsyncpa [#allocation5], 1 }
 0x305   :  { %807 = vsyncpa [#allocation5 + $0x1], 1 }

</bundles_post_ra>
